<compile_context>
chip_gen: v5e
topology: v5e:2x2
jax: 0.10.0
libtpu: 0.0.40
codegen_flags: <defaults>
</compile_context>

<pallas_src>
import functools
import math

import jax
import jax.numpy as jnp
from jax.experimental import pallas as pl
from jax.experimental.pallas import tpu as pltpu

_SQRT_2_OVER_PI = math.sqrt(2.0 / math.pi)
_SUBLANE = 8


def _cdiv(a, b):
    return -(-a // b)


def _round_up(x, m):
    return _cdiv(x, m) * m


def _gelu_tanh(x):
    return 0.5 * x * (1.0 + jnp.tanh(_SQRT_2_OVER_PI * (x + 0.044715 * (x * x * x))))


def _row_tiling(m, tm, min_blocks=2):
    """Row tile that divides the minimally (8-)padded row count; waste <= 8*nb rows."""
    nb = _cdiv(m, tm)
    if m >= 2 * _SUBLANE:
        nb = max(nb, min_blocks)   # >=2 blocks: megacore sharding + DMA/compute overlap
    tile = _round_up(_cdiv(m, nb), _SUBLANE)
    nb = _cdiv(m, tile)
    return tile, nb, tile * nb


# ---------------------------------------------------------------------------
# Kernels
# ---------------------------------------------------------------------------
def _score_affine_kernel(x_ref, w1_ref, b1_ref, w2_ref, b2_ref, s_ref, t_ref,
                         score_ref, base_ref):
    # Fused: token-selector MLP (kept f32 -> deterministic top-k) + norm1 RepBN
    # affine base, single read of the token tile.
    x = x_ref[...]
    h = jnp.dot(x, w1_ref[...], preferred_element_type=jnp.float32) + b1_ref[...]
    h = _gelu_tanh(h)
    logit = jnp.sum(h * w2_ref[...], axis=-1, keepdims=True) + b2_ref[...]
    # TODO(synk): score store is lane-sparse (last dim 1); a transposed (1, tile)
    # layout would make it an unmasked store — skipped to keep lowering simple.
    score_ref[...] = (1.0 / (1.0 + jnp.exp(-logit))).astype(score_ref.dtype)
    base_ref[...] = (x * s_ref[...] + t_ref[...]).astype(base_ref.dtype)


def _dense_kernel(x_ref, w_ref, b_ref, o_ref, *, activation, mxu_dtype):
    x = x_ref[...].astype(mxu_dtype)          # bf16 MXU operands, f32 accumulate
    acc = jnp.dot(x, w_ref[...], preferred_element_type=jnp.float32) + b_ref[...]
    if activation == "gelu":
        acc = _gelu_tanh(acc)                 # epilogue math stays f32 (v5e-safe)
    o_ref[...] = acc.astype(o_ref.dtype)


def _dense_res_affine_kernel(x_ref, w_ref, b_ref, res_ref, s_ref, t_ref, o_ref,
                             *, mxu_dtype):
    # out = ((x @ w + b) + res) * scale[c] + shift[c]   (fc2 + residual + RepBN)
    x = x_ref[...].astype(mxu_dtype)
    acc = jnp.dot(x, w_ref[...], preferred_element_type=jnp.float32) + b_ref[...]
    y = (acc + res_ref[...]) * s_ref[...] + t_ref[...]
    o_ref[...] = y.astype(o_ref.dtype)


def _attn_kernel(qkv_ref, sel_ref, wo_ref, bo_ref, s1_ref, t1_ref, o_ref, *,
                 num_heads, head_dim, num_valid, scale, mxu_dtype):
    # One batch per grid step: all heads + out-proj + residual + norm1 affine.
    e = num_heads * head_dim
    kp = qkv_ref.shape[0]
    qkv = qkv_ref[...]
    q = (qkv[:, 0:e] * scale).astype(mxu_dtype)          # scale folded into q
    k = qkv[:, e:2 * e].astype(mxu_dtype)
    v = qkv[:, 2 * e:3 * e].astype(mxu_dtype)
    needs_mask = num_valid < kp
    if needs_mask:
        key_ids = jax.lax.broadcasted_iota(jnp.int32, (kp, kp), 1)
    approx = mxu_dtype != jnp.float32
    head_outs = []
    for h in range(num_heads):                            # static unroll over heads
        lo = h * head_dim
        qh = q[:, lo:lo + head_dim]
        kh = k[:, lo:lo + head_dim]
        vh = v[:, lo:lo + head_dim]
        s = jnp.einsum("qd,kd->qk", qh, kh, preferred_element_type=jnp.float32)
        if needs_mask:
            s = jnp.where(key_ids < num_valid, s, -1e30)  # mask padded keys
        m = jnp.max(s, axis=-1, keepdims=True)
        p = jnp.exp(s - m)
        inv = pl.reciprocal(jnp.sum(p, axis=-1, keepdims=True), approx=approx)
        oh = jnp.einsum("qk,kd->qd", p.astype(mxu_dtype), vh,
                        preferred_element_type=jnp.float32)
        head_outs.append(oh * inv)                        # divide (K,hd), not (K,K)
    o_cat = jnp.concatenate(head_outs, axis=-1)           # lane-dense (K, E)
    proj = jnp.dot(o_cat.astype(mxu_dtype), wo_ref[...],
                   preferred_element_type=jnp.float32) + bo_ref[...]
    y = (sel_ref[...] + proj) * s1_ref[...] + t1_ref[...]
    o_ref[...] = y.astype(o_ref.dtype)


# ---------------------------------------------------------------------------
# Pallas-call wrappers
# ---------------------------------------------------------------------------
def token_scores_and_norm_base(xp, w1, b1, w2, b2, scale, shift, *, tile, nb):
    mp, c = xp.shape
    hdim = w1.shape[1]
    scores, base = pl.pallas_call(
        _score_affine_kernel,
        out_shape=(jax.ShapeDtypeStruct((mp, 1), xp.dtype),
                   jax.ShapeDtypeStruct((mp, c), xp.dtype)),
        grid=(nb,),
        in_specs=[
            pl.BlockSpec((tile, c), lambda i: (i, 0)),
            pl.BlockSpec((c, hdim), lambda i: (0, 0)),
            pl.BlockSpec((1, hdim), lambda i: (0, 0)),
            pl.BlockSpec((1, hdim), lambda i: (0, 0)),
            pl.BlockSpec((1, 1), lambda i: (0, 0)),
            pl.BlockSpec((1, c), lambda i: (0, 0)),
            pl.BlockSpec((1, c), lambda i: (0, 0)),
        ],
        out_specs=(pl.BlockSpec((tile, 1), lambda i: (i, 0)),
                   pl.BlockSpec((tile, c), lambda i: (i, 0))),
        compiler_params=pltpu.CompilerParams(dimension_semantics=("parallel",)),
    )(xp, w1, b1.reshape(1, hdim), w2.reshape(1, hdim), b2.reshape(1, 1),
      scale.reshape(1, c), shift.reshape(1, c))
    return scores[:, 0], base


def dense(x, w, b, activation=None, *, mxu_dtype=jnp.bfloat16, tm=512):
    """x:(M,K) @ w:(K,N) + b, optional fused GELU.  Row-tiled, bf16 MXU operands."""
    m, kd = x.shape
    n = w.shape[1]
    tile, nb, mp = _row_tiling(m, tm)
    xp = x if mp == m else jnp.pad(x, ((0, mp - m), (0, 0)))
    w_bytes = kd * n * (2 if mxu_dtype == jnp.bfloat16 else 4)
    out = pl.pallas_call(
        functools.partial(_dense_kernel, activation=activation, mxu_dtype=mxu_dtype),
        out_shape=jax.ShapeDtypeStruct((mp, n), x.dtype),
        grid=(nb,),
        in_specs=[
            pl.BlockSpec((tile, kd), lambda i: (i, 0)),
            pl.BlockSpec((kd, n), lambda i: (0, 0)),
            pl.BlockSpec((1, n), lambda i: (0, 0)),
        ],
        out_specs=pl.BlockSpec((tile, n), lambda i: (i, 0)),
        compiler_params=pltpu.CompilerParams(dimension_semantics=("parallel",)),
        cost_estimate=pl.CostEstimate(
            flops=2 * mp * kd * n,
            transcendentals=mp * n if activation == "gelu" else 0,
            bytes_accessed=4 * mp * (kd + n) + w_bytes),
    )(xp, w.astype(mxu_dtype), b.reshape(1, n))
    return out if mp == m else out[:m]


def dense_residual_repbn(x, w, b, res, scale, shift, *, mxu_dtype=jnp.bfloat16, tm=512):
    """((x @ w + b) + res) * scale[c] + shift[c]  (fc2 + residual + norm2 fused)."""
    m, kd = x.shape
    n = w.shape[1]
    tile, nb, mp = _row_tiling(m, tm)
    if mp != m:
        x = jnp.pad(x, ((0, mp - m), (0, 0)))
        res = jnp.pad(res, ((0, mp - m), (0, 0)))
    w_bytes = kd * n * (2 if mxu_dtype == jnp.bfloat16 else 4)
    out = pl.pallas_call(
        functools.partial(_dense_res_affine_kernel, mxu_dtype=mxu_dtype),
        out_shape=jax.ShapeDtypeStruct((mp, n), x.dtype),
        grid=(nb,),
        in_specs=[
            pl.BlockSpec((tile, kd), lambda i: (i, 0)),
            pl.BlockSpec((kd, n), lambda i: (0, 0)),
            pl.BlockSpec((1, n), lambda i: (0, 0)),
            pl.BlockSpec((tile, n), lambda i: (i, 0)),
            pl.BlockSpec((1, n), lambda i: (0, 0)),
            pl.BlockSpec((1, n), lambda i: (0, 0)),
        ],
        out_specs=pl.BlockSpec((tile, n), lambda i: (i, 0)),
        compiler_params=pltpu.CompilerParams(dimension_semantics=("parallel",)),
        cost_estimate=pl.CostEstimate(
            flops=2 * mp * kd * n,
            transcendentals=0,
            bytes_accessed=4 * mp * (kd + 2 * n) + w_bytes),
    )(x, w.astype(mxu_dtype), b.reshape(1, n), res,
      scale.reshape(1, n), shift.reshape(1, n))
    return out if mp == m else out[:m]


def attention_block(qkv, sel, wo, bo, scale1, shift1, *, num_heads, num_valid,
                    mxu_dtype=jnp.bfloat16):
    """Per-batch MHA core: all heads + out-proj + residual + norm1 affine."""
    bsz, kp, e3 = qkv.shape
    e = e3 // 3
    head_dim = e // num_heads
    kernel = functools.partial(
        _attn_kernel, num_heads=num_heads, head_dim=head_dim,
        num_valid=num_valid, scale=1.0 / math.sqrt(head_dim), mxu_dtype=mxu_dtype)
    return pl.pallas_call(
        kernel,
        out_shape=jax.ShapeDtypeStruct((bsz, kp, e), sel.dtype),
        grid=(bsz,),
        in_specs=[
            pl.BlockSpec((None, kp, e3), lambda b: (b, 0, 0)),
            pl.BlockSpec((None, kp, e), lambda b: (b, 0, 0)),
            pl.BlockSpec((e, e), lambda b: (0, 0)),
            pl.BlockSpec((1, e), lambda b: (0, 0)),
            pl.BlockSpec((1, e), lambda b: (0, 0)),
            pl.BlockSpec((1, e), lambda b: (0, 0)),
        ],
        out_specs=pl.BlockSpec((None, kp, e), lambda b: (b, 0, 0)),
        compiler_params=pltpu.CompilerParams(dimension_semantics=("parallel",)),
    )(qkv, sel, wo.astype(mxu_dtype), bo.reshape(1, e),
      scale1.reshape(1, e), shift1.reshape(1, e))


def _repbn_scale_shift(p, eps=1e-5):
    inv = p["gamma"] * jax.lax.rsqrt(p["var"] + eps)
    scale = p["alpha"] + inv
    shift = p["beta"] - p["mean"] * inv
    return scale, shift


# ---------------------------------------------------------------------------
# Full AIFI_Dynamic forward (eval mode)
# ---------------------------------------------------------------------------
def aifi_dynamic_forward(x, params, *, num_heads=8, keep_ratio=0.7,
                         mxu_dtype=jnp.bfloat16, tm=512, debug_return=False):
    bsz, c, h, w = x.shape
    s = h * w
    m = bsz * s

    xt = jnp.transpose(x.reshape(bsz, c, s), (0, 2, 1))          # (B, S, C)
    xf = xt.reshape(m, c)

    # Pad the token-row axis once (8-aligned, tile-divisible) and slice once at end.
    tile, nb, mp = _row_tiling(m, tm)
    xf_p = xf if mp == m else jnp.pad(xf, ((0, mp - m), (0, 0)))

    s1, t1 = _repbn_scale_shift(params["norm1"])
    s2, t2 = _repbn_scale_shift(params["norm2"])

    # 1) token scores fused with the norm1 affine base (one read of x).
    scores_p, base_p = token_scores_and_norm_base(
        xf_p, params["sel_w1"], params["sel_b1"], params["sel_w2"], params["sel_b2"],
        s1, t1, tile=tile, nb=nb)
    scores = scores_p[:m].reshape(bsz, s)

    # 2) top-k + gather of selected tokens (XLA; no clean Pallas top-k on TPU).
    num_keep = max(1, int(s * keep_ratio))
    _, keep_idx = jax.lax.top_k(scores, num_keep)                 # (B, K)
    kpad = _round_up(num_keep, _SUBLANE)                          # align K to 8
    flat_idx = jnp.arange(bsz, dtype=keep_idx.dtype)[:, None] * s + keep_idx
    flat_idx_p = (flat_idx if kpad == num_keep
                  else jnp.pad(flat_idx, ((0, 0), (0, kpad - num_keep))))
    sel_p = xf_p[flat_idx_p]                                      # (B, Kp, C)

    # 3) QKV projection over the selected rows (one row-tiled matmul).
    qkv = dense(sel_p.reshape(bsz * kpad, c), params["attn_in_w"],
                params["attn_in_b"], mxu_dtype=mxu_dtype, tm=tm
                ).reshape(bsz, kpad, 3 * c)

    # 4) fused per-batch attention + out-proj + residual + norm1 affine.
    y_sel = attention_block(qkv, sel_p, params["attn_out_w"], params["attn_out_b"],
                            s1, t1, num_heads=num_heads, num_valid=num_keep,
                            mxu_dtype=mxu_dtype)                  # (B, Kp, C)

    # 5) write selected rows into the affine base (unselected rows of base_p
    #    already equal (x + 0)*scale1 + shift1; no zeros+scatter+add pass).
    xn = base_p.at[flat_idx.reshape(-1)].set(
        y_sel[:, :num_keep, :].reshape(bsz * num_keep, c), unique_indices=True)

    # 6) FFN: fc1 (+GELU), then fc2 with residual + norm2 affine fused.
    h1 = dense(xn, params["fc1_w"], params["fc1_b"], activation="gelu",
               mxu_dtype=mxu_dtype, tm=tm)
    out_p = dense_residual_repbn(h1, params["fc2_w"], params["fc2_b"], xn, s2, t2,
                                 mxu_dtype=mxu_dtype, tm=tm)

    out = out_p if mp == m else out_p[:m]
    out = jnp.transpose(out.reshape(bsz, s, c), (0, 2, 1)).reshape(bsz, c, h, w)
    if debug_return:
        return out, scores, keep_idx
    return out


# ---------------------------------------------------------------------------
# Pure-JAX reference (literal RepBN form, 'highest'-precision matmuls)
# ---------------------------------------------------------------------------
def _repbn_ref(z, p, eps=1e-5):
    bn = (z - p["mean"]) * jax.lax.rsqrt(p["var"] + eps) * p["gamma"] + p["beta"]
    return bn + p["alpha"] * z


def _reference_forward(x, params, *, num_heads=8, keep_ratio=0.7, keep_idx=None):
    hi = "highest"
    bsz, c, h, w = x.shape
    s = h * w
    xt = jnp.transpose(x.reshape(bsz, c, s), (0, 2, 1))
    hid = _gelu_tanh(jnp.einsum("bsc,ch->bsh", xt, params["sel_w1"], precision=hi)
                     + params["sel_b1"])
    logits = jnp.einsum("bsh,ho->bso", hid, params["sel_w2"], precision=hi)[..., 0]
    logits = logits + params["sel_b2"][0]
    scores = 1.0 / (1.0 + jnp.exp(-logits))
    num_keep = max(1, int(s * keep_ratio))
    if keep_idx is None:
        _, keep_idx = jax.lax.top_k(scores, num_keep)
    sel = jnp.take_along_axis(xt, keep_idx[:, :, None], axis=1)
    hd = c // num_heads
    qkv = jnp.einsum("bkc,cd->bkd", sel, params["attn_in_w"], precision=hi) + params["attn_in_b"]
    qkv = qkv.reshape(bsz, num_keep, 3, num_heads, hd)
    q = jnp.transpose(qkv[:, :, 0], (0, 2, 1, 3))
    k = jnp.transpose(qkv[:, :, 1], (0, 2, 1, 3))
    v = jnp.transpose(qkv[:, :, 2], (0, 2, 1, 3))
    att = jnp.einsum("bhqd,bhkd->bhqk", q, k, precision=hi) / math.sqrt(hd)
    p = jax.nn.softmax(att, axis=-1)
    o = jnp.einsum("bhqk,bhkd->bhqd", p, v, precision=hi)
    o = jnp.transpose(o, (0, 2, 1, 3)).reshape(bsz, num_keep, c)
    attn_out = jnp.einsum("bkc,cd->bkd", o, params["attn_out_w"], precision=hi) + params["attn_out_b"]
    scatter = jnp.zeros_like(xt).at[jnp.arange(bsz)[:, None], keep_idx].set(attn_out)
    xn = _repbn_ref(xt + scatter, params["norm1"])
    h1 = _gelu_tanh(jnp.einsum("bsc,cm->bsm", xn, params["fc1_w"], precision=hi) + params["fc1_b"])
    x2 = jnp.einsum("bsm,mc->bsc", h1, params["fc2_w"], precision=hi) + params["fc2_b"]
    out = _repbn_ref(xn + x2, params["norm2"])
    return jnp.transpose(out, (0, 2, 1)).reshape(bsz, c, h, w), scores


# ---------------------------------------------------------------------------
# Parameter construction (deterministic random to exercise the math)
# ---------------------------------------------------------------------------
def init_params(key, c1, cm):
    hidden = int(c1 * 0.25)
    keys = iter(jax.random.split(key, 32))

    def nrm(shape, scale=1.0):
        return jax.random.normal(next(keys), shape, jnp.float32) * scale

    def norm_params():
        return dict(
            alpha=jnp.ones((1,), jnp.float32),
            gamma=1.0 + 0.1 * nrm((c1,)),
            beta=0.1 * nrm((c1,)),
            mean=0.1 * nrm((c1,)),
            var=0.5 + 0.5 * jnp.abs(nrm((c1,))),
        )

    return dict(
        sel_w1=nrm((c1, hidden), 1.0 / math.sqrt(c1)),
        sel_b1=nrm((hidden,), 0.1),
        sel_w2=nrm((hidden, 1), 1.0 / math.sqrt(hidden)),
        sel_b2=nrm((1,), 0.1),
        attn_in_w=nrm((c1, 3 * c1), 1.0 / math.sqrt(c1)),
        attn_in_b=nrm((3 * c1,), 0.1),
        attn_out_w=nrm((c1, c1), 1.0 / math.sqrt(c1)),
        attn_out_b=nrm((c1,), 0.1),
        fc1_w=nrm((c1, cm), 1.0 / math.sqrt(c1)),
        fc1_b=nrm((cm,), 0.1),
        fc2_w=nrm((cm, c1), 1.0 / math.sqrt(cm)),
        fc2_b=nrm((c1,), 0.1),
        norm1=norm_params(),
        norm2=norm_params(),
    )


if __name__ == "__main__":
    key = jax.random.PRNGKey(0)
    kx, kparam = jax.random.split(key)

    B, C, H, W = 2, 64, 8, 8        # c1=64, 8 heads -> head_dim=8, seq=64
    NUM_HEADS = 8
    CM = 128                         # small FFN width for the demo (cm=2048 in the module)

    x = jax.random.normal(kx, (B, C, H, W), dtype=jnp.float32)
    params = init_params(kparam, C, CM)

    out, scores, keep_idx = aifi_dynamic_forward(
        x, params, num_heads=NUM_HEADS, keep_ratio=0.7,
        mxu_dtype=jnp.bfloat16, debug_return=True)
    jax.block_until_ready(out)

    # The reference reuses the kernel's keep_idx so near-tie top-k ordering (a pure
    # float-precision ambiguity) cannot flip the comparison; token scores are
    # checked tightly on their own.
    ref_out, ref_scores = _reference_forward(
        x, params, num_heads=NUM_HEADS, keep_ratio=0.7, keep_idx=keep_idx)

    assert out.shape == x.shape and out.dtype == x.dtype
    score_err = float(jnp.max(jnp.abs(scores - ref_scores)))
    assert score_err < 5e-3, f"score_err={score_err}"
    # Wider band because the MXU operands are bf16 (per perf feedback); accumulation
    # and epilogues are f32, so this still catches any structural/indexing bug.
    max_err = float(jnp.max(jnp.abs(out - ref_out)))
    assert bool(jnp.allclose(out, ref_out, atol=1e-1, rtol=5e-2)), f"max_err={max_err}"
    print("KERNEL_OK")
</pallas_src>

<mosaic_0001>
module attributes {stable_mosaic.version = 11 : i64} {
  func.func @_score_affine_kernel(%arg0: i32, %arg1: memref<64x64xf32, #tpu.memory_space<vmem>>, %arg2: memref<64x16xf32, #tpu.memory_space<vmem>>, %arg3: memref<1x16xf32, #tpu.memory_space<vmem>>, %arg4: memref<1x16xf32, #tpu.memory_space<vmem>>, %arg5: memref<1x1xf32, #tpu.memory_space<vmem>>, %arg6: memref<1x64xf32, #tpu.memory_space<vmem>>, %arg7: memref<1x64xf32, #tpu.memory_space<vmem>>, %arg8: memref<64x1xf32, #tpu.memory_space<vmem>>, %arg9: memref<64x64xf32, #tpu.memory_space<vmem>>) attributes {dimension_semantics = [#tpu.dimension_semantics<parallel>], iteration_bounds = array<i64: 2>, scalar_prefetch = 0 : i64, scratch_operands = 0 : i64, tpu.core_type = #tpu.core_type<tc>, window_params = [{transform_indices = @transform_0, window_bounds = array<i64: 64, 64>}, {pipeline_mode = #tpu.pipeline_mode<synchronous>, transform_indices = @transform_1, window_bounds = array<i64: 64, 16>}, {pipeline_mode = #tpu.pipeline_mode<synchronous>, transform_indices = @transform_2, window_bounds = array<i64: 1, 16>}, {pipeline_mode = #tpu.pipeline_mode<synchronous>, transform_indices = @transform_3, window_bounds = array<i64: 1, 16>}, {pipeline_mode = #tpu.pipeline_mode<synchronous>, transform_indices = @transform_4, window_bounds = array<i64: 1, 1>}, {pipeline_mode = #tpu.pipeline_mode<synchronous>, transform_indices = @transform_5, window_bounds = array<i64: 1, 64>}, {pipeline_mode = #tpu.pipeline_mode<synchronous>, transform_indices = @transform_6, window_bounds = array<i64: 1, 64>}, {transform_indices = @transform_7, window_bounds = array<i64: 64, 1>}, {transform_indices = @transform_8, window_bounds = array<i64: 64, 64>}]} {
    %c0 = arith.constant 0 : index
    %c0_0 = arith.constant 0 : index
    %0 = vector.load %arg1[%c0, %c0_0] : memref<64x64xf32, #tpu.memory_space<vmem>>, vector<64x64xf32>
    %c0_1 = arith.constant 0 : index
    %c0_2 = arith.constant 0 : index
    %1 = vector.load %arg2[%c0_1, %c0_2] : memref<64x16xf32, #tpu.memory_space<vmem>>, vector<64x16xf32>
    %cst = arith.constant dense<0.000000e+00> : vector<64x16xf32>
    %2 = tpu.matmul %0, %1, %cst {dimension_numbers = #tpu.dot_dimension_numbers<[1], [0], [0], [1], [0, 0, 1, 1], [], []>} : vector<64x64xf32>, vector<64x16xf32>, vector<64x16xf32> -> vector<64x16xf32>
    %c0_3 = arith.constant 0 : index
    %c0_4 = arith.constant 0 : index
    %3 = vector.load %arg3[%c0_3, %c0_4] : memref<1x16xf32, #tpu.memory_space<vmem>>, vector<1x16xf32>
    %4 = vector.broadcast %3 : vector<1x16xf32> to vector<64x16xf32>
    %5 = arith.addf %2, %4 : vector<64x16xf32>
    %cst_5 = arith.constant 5.000000e-01 : f32
    %6 = vector.broadcast %cst_5 : f32 to vector<64x16xf32>
    %7 = arith.mulf %6, %5 : vector<64x16xf32>
    %8 = arith.mulf %5, %5 : vector<64x16xf32>
    %9 = arith.mulf %8, %5 : vector<64x16xf32>
    %cst_6 = arith.constant 4.471500e-02 : f32
    %10 = vector.broadcast %cst_6 : f32 to vector<64x16xf32>
    %11 = arith.mulf %10, %9 : vector<64x16xf32>
    %12 = arith.addf %5, %11 : vector<64x16xf32>
    %cst_7 = arith.constant 0.797884583 : f32
    %13 = vector.broadcast %cst_7 : f32 to vector<64x16xf32>
    %14 = arith.mulf %13, %12 : vector<64x16xf32>
    %15 = math.tanh %14 : vector<64x16xf32>
    %cst_8 = arith.constant 1.000000e+00 : f32
    %16 = vector.broadcast %cst_8 : f32 to vector<64x16xf32>
    %17 = arith.addf %16, %15 : vector<64x16xf32>
    %18 = arith.mulf %7, %17 : vector<64x16xf32>
    %c0_9 = arith.constant 0 : index
    %c0_10 = arith.constant 0 : index
    %19 = vector.load %arg4[%c0_9, %c0_10] : memref<1x16xf32, #tpu.memory_space<vmem>>, vector<1x16xf32>
    %20 = vector.broadcast %19 : vector<1x16xf32> to vector<64x16xf32>
    %21 = arith.mulf %18, %20 : vector<64x16xf32>
    %cst_11 = arith.constant dense<0.000000e+00> : vector<64xf32>
    %22 = vector.multi_reduction <add>, %21, %cst_11 [1] : vector<64x16xf32> to vector<64xf32>
    %23 = vector.shape_cast %22 : vector<64xf32> to vector<64x1xf32>
    %c0_12 = arith.constant 0 : index
    %c0_13 = arith.constant 0 : index
    %24 = vector.load %arg5[%c0_12, %c0_13] : memref<1x1xf32, #tpu.memory_space<vmem>>, vector<1x1xf32>
    %25 = vector.broadcast %24 : vector<1x1xf32> to vector<64x1xf32>
    %26 = arith.addf %23, %25 : vector<64x1xf32>
    %cst_14 = arith.constant 0.000000e+00 : f32
    %27 = vector.broadcast %cst_14 : f32 to vector<64x1xf32>
    %28 = arith.subf %27, %26 : vector<64x1xf32>
    %29 = math.exp %28 : vector<64x1xf32>
    %cst_15 = arith.constant 1.000000e+00 : f32
    %30 = vector.broadcast %cst_15 : f32 to vector<64x1xf32>
    %31 = arith.addf %30, %29 : vector<64x1xf32>
    %cst_16 = arith.constant 1.000000e+00 : f32
    %32 = vector.broadcast %cst_16 : f32 to vector<64x1xf32>
    %33 = arith.divf %32, %31 : vector<64x1xf32>
    %c0_17 = arith.constant 0 : index
    %c0_18 = arith.constant 0 : index
    %34 = vector.load %arg8[%c0_17, %c0_18] : memref<64x1xf32, #tpu.memory_space<vmem>>, vector<64x1xf32>
    tpu.vector_store %arg8[%c0_17, %c0_18], %33 {strides = array<i32>} : memref<64x1xf32, #tpu.memory_space<vmem>>, vector<64x1xf32>,
    %c0_19 = arith.constant 0 : index
    %c0_20 = arith.constant 0 : index
    %35 = vector.load %arg6[%c0_19, %c0_20] : memref<1x64xf32, #tpu.memory_space<vmem>>, vector<1x64xf32>
    %36 = vector.broadcast %35 : vector<1x64xf32> to vector<64x64xf32>
    %37 = arith.mulf %0, %36 : vector<64x64xf32>
    %c0_21 = arith.constant 0 : index
    %c0_22 = arith.constant 0 : index
    %38 = vector.load %arg7[%c0_21, %c0_22] : memref<1x64xf32, #tpu.memory_space<vmem>>, vector<1x64xf32>
    %39 = vector.broadcast %38 : vector<1x64xf32> to vector<64x64xf32>
    %40 = arith.addf %37, %39 : vector<64x64xf32>
    %c0_23 = arith.constant 0 : index
    %c0_24 = arith.constant 0 : index
    %41 = vector.load %arg9[%c0_23, %c0_24] : memref<64x64xf32, #tpu.memory_space<vmem>>, vector<64x64xf32>
    tpu.vector_store %arg9[%c0_23, %c0_24], %40 {strides = array<i32>} : memref<64x64xf32, #tpu.memory_space<vmem>>, vector<64x64xf32>,
    return
  }
  func.func @transform_0(%arg0: i32) -> (i32, i32) {
    %c0_i32 = arith.constant 0 : i32
    %c0_i32_0 = arith.constant 0 : i32
    return %arg0, %c0_i32 : i32, i32
  }
  func.func @transform_1(%arg0: i32) -> (i32, i32) {
    %c0_i32 = arith.constant 0 : i32
    %c0_i32_0 = arith.constant 0 : i32
    %c0_i32_1 = arith.constant 0 : i32
    return %c0_i32, %c0_i32_0 : i32, i32
  }
  func.func @transform_2(%arg0: i32) -> (i32, i32) {
    %c0_i32 = arith.constant 0 : i32
    %c0_i32_0 = arith.constant 0 : i32
    %c0_i32_1 = arith.constant 0 : i32
    return %c0_i32, %c0_i32_0 : i32, i32
  }
  func.func @transform_3(%arg0: i32) -> (i32, i32) {
    %c0_i32 = arith.constant 0 : i32
    %c0_i32_0 = arith.constant 0 : i32
    %c0_i32_1 = arith.constant 0 : i32
    return %c0_i32, %c0_i32_0 : i32, i32
  }
  func.func @transform_4(%arg0: i32) -> (i32, i32) {
    %c0_i32 = arith.constant 0 : i32
    %c0_i32_0 = arith.constant 0 : i32
    %c0_i32_1 = arith.constant 0 : i32
    return %c0_i32, %c0_i32_0 : i32, i32
  }
  func.func @transform_5(%arg0: i32) -> (i32, i32) {
    %c0_i32 = arith.constant 0 : i32
    %c0_i32_0 = arith.constant 0 : i32
    %c0_i32_1 = arith.constant 0 : i32
    return %c0_i32, %c0_i32_0 : i32, i32
  }
  func.func @transform_6(%arg0: i32) -> (i32, i32) {
    %c0_i32 = arith.constant 0 : i32
    %c0_i32_0 = arith.constant 0 : i32
    %c0_i32_1 = arith.constant 0 : i32
    return %c0_i32, %c0_i32_0 : i32, i32
  }
  func.func @transform_7(%arg0: i32) -> (i32, i32) {
    %c0_i32 = arith.constant 0 : i32
    %c0_i32_0 = arith.constant 0 : i32
    return %arg0, %c0_i32 : i32, i32
  }
  func.func @transform_8(%arg0: i32) -> (i32, i32) {
    %c0_i32 = arith.constant 0 : i32
    %c0_i32_0 = arith.constant 0 : i32
    return %arg0, %c0_i32 : i32, i32
  }
}

</mosaic_0001>

<bundles_post_ra>
// kernel: tpu_custom_call.1
= control target key start
LH: loop header
LB: loop body
LE: loop exit
PB: predicated region body
PF: predicated region fallthrough
CT: control target
= control target key end

     0   :  { %s977_s29 = smov 0   ;;  %s1181_s0 = inlined_call_operand.vmem [shape: f32[128,64], index: 0, kind: input, shape index: {}]   ;;  %s1182_s1 = inlined_call_operand.vmem [shape: f32[64,16], index: 1, kind: input, shape index: {}]   ;;  %s1183_s2 = inlined_call_operand.vmem [shape: f32[1,16], index: 2, kind: input, shape index: {}]   ;;  %s1184_s3 = inlined_call_operand.vmem [shape: f32[1,16], index: 3, kind: input, shape index: {}]   ;;  %s1185_s4 = inlined_call_operand.<no memory space> [shape: f32[1,1], index: 4, kind: input, shape index: {}]   ;;  %s1186_s5 = inlined_call_operand.vmem [shape: f32[1,64], index: 5, kind: input, shape index: {}]   ;;  %s1187_s6 = inlined_call_operand.vmem [shape: f32[1,64], index: 6, kind: input, shape index: {}]   ;;  %s1188_s7 = inlined_call_operand.vmem [shape: f32[128,1], index: 7, kind: output, shape index: {0}]   ;;  %s1189_s8 = inlined_call_operand.vmem [shape: f32[128,64], index: 8, kind: output, shape index: {1}]  }
   0x1   :  { %v14_v0 = vstv %s1185_s4 }
   0x2   :  { %15 = vst [vmem:[#allocation2] sm:$0x1] %v14_v0 }
   0x3 LB: > { %s815_s30 = sadd.s32 4294967295, %s927_s29   ;;  %p819_p0 = scmp.ge.s32.totalorder %s927_s29, 1  ;;  %s927_s29 = sphi %s977_s29, %s21_s29  }
   0x4   : > { %p268_p1 = scmp.lt.s32.totalorder %s927_s29, 3 }
   0x6   : > { %p269_p2 = pnand %p819_p0, %p268_p1 }
   0x7   : > { %s820_s12 = sshll.u32 (!%p269_p2), %s815_s30, 3 }
   0x8   : > { %272 = sbr.rel (%p269_p2) target bundleno = 353 (0x161), region = 48  ;;  %p308_p3 = scmp.lt.s32.totalorder (!%p269_p2), %s820_s12, 15 }
   0xd   : > { %v340_v1 = vld [vmem:[%s1182_s1 + $0x38] sm:$0xff]  ;;  %v339_v2 = vld [vmem:[%s1182_s1 + $0x30] sm:$0xff]  ;;  %v338_v3 = vld [vmem:[%s1182_s1 + $0x28] sm:$0xff]  ;;  %s1193_s12 = smov (!%p308_p3, %s820_s12), 15  ;;  %vm345_vm0 = vcmask 523264   ;;  %vm495_vm1 = vcmask 130048  }
   0xe   : > { %378 = vmatpush.msra.mxu0 %v340_v1  ;;  %836 = vmatpush.msra.mxu1 %v340_v1  ;;  %v337_v4 = vld [vmem:[%s1182_s1 + $0x20] sm:$0xff]  ;;  %s1000_s19 = sshll.u32 %s1193_s12, 3  ;;  %v336_v6 = vld [vmem:[%s1182_s1 + $0x18] sm:$0xff]  ;;  %v335_v7 = vld [vmem:[%s1182_s1 + $0x10] sm:$0xff]  ;;  %vm684_vm2 = vcmask 7168  }
   0xf   : > { %837 = vmatpush.msra.mxu2 %v340_v1  ;;  %838 = vmatpush.msra.mxu3 %v340_v1  ;;  %v868_v5 = vld [vmem:[%s1186_s5] ss:$0 sm:$0xff]  ;;  %s1012_s26 = scalar_lea.vmem %s1181_s0, %s1000_s19  ;;  %s1027_s10 = scalar_lea.vmem %s1189_s8, %s1000_s19  ;;  %v334_v21 = vld [vmem:[%s1182_s1 + $0x8] sm:$0xff] }
  0x10   : > { %379 = vmatpush.msra.mxu0 %v339_v2  ;;  %839 = vmatpush.msra.mxu1 %v339_v2  ;;  %v869_v8 = vld [vmem:[%s1187_s6] ss:$0 sm:$0xff]  ;;  %v327_v10 = vld [vmem:[%s1012_s26 + $0x10] sm:$0xff]  ;;  %v326_v16 = vld [vmem:[%s1012_s26 + $0x8] sm:$0xff]  ;;  %s1130_s21 = scalar_lea.vmem %s1188_s7, %s1000_s19 }
  0x11   : > { %840 = vmatpush.msra.mxu2 %v339_v2  ;;  %841 = vmatpush.msra.mxu3 %v339_v2  ;;  %v325_v9 = vld [vmem:[%s1012_s26] sm:$0xff]  ;;  %v699_v13 = vmul.f32 %v868_v5, %v327_v10  ;;  %v331_v15 = vld [vmem:[%s1012_s26 + $0x30] sm:$0xff]  ;;  %v328_v17 = vld [vmem:[%s1012_s26 + $0x18] sm:$0xff]  ;;  %v698_v19 = vmul.f32 %v868_v5, %v326_v16 }
  0x12   : > { %380 = vmatpush.msra.mxu0 %v338_v3  ;;  %842 = vmatpush.msra.mxu1 %v338_v3  ;;  %v329_v11 = vld [vmem:[%s1012_s26 + $0x20] sm:$0xff]  ;;  %v697_v12 = vmul.f32 %v868_v5, %v325_v9  ;;  %v703_v18 = vmul.f32 %v868_v5, %v331_v15  ;;  %v700_v20 = vmul.f32 %v868_v5, %v328_v17  ;;  %v330_v26 = vld [vmem:[%s1012_s26 + $0x28] sm:$0xff]  ;;  %v332_v27 = vld [vmem:[%s1012_s26 + $0x38] sm:$0xff] }
  0x13   : > { %843 = vmatpush.msra.mxu2 %v338_v3  ;;  %844 = vmatpush.msra.mxu3 %v338_v3  ;;  %v701_v14 = vmul.f32 %v868_v5, %v329_v11  ;;  %v711_v23 = vadd.f32 %v869_v8, %v699_v13  ;;  %v333_v28 = vld [vmem:[%s1182_s1] sm:$0xff]  ;;  %v710_v29 = vadd.f32 %v869_v8, %v698_v19 }
  0x14   : > { %381 = vmatpush.msra.mxu0 %v337_v4  ;;  %845 = vmatpush.msra.mxu1 %v337_v4  ;;  %v709_v22 = vadd.f32 %v869_v8, %v697_v12  ;;  %v715_v25 = vadd.f32 %v869_v8, %v703_v18  ;;  %v702_v30 = vmul.f32 %v868_v5, %v330_v26  ;;  %v870_v35 = vld [vmem:[%s1183_s2] ss:$0 sm:$0xff] }
  0x15   : > { %846 = vmatpush.msra.mxu2 %v337_v4  ;;  %847 = vmatpush.msra.mxu3 %v337_v4  ;;  %v713_v24 = vadd.f32 %v869_v8, %v701_v14  ;;  %v704_v31 = vmul.f32 %v868_v5, %v332_v27  ;;  %719 = vst.msk [vmem:[%s1027_s10 + $0x10] sm:$0xff] %vm345_vm0, %v711_v23 }
  0x16   : > { %382 = vmatpush.msra.mxu0 %v336_v6  ;;  %848 = vmatpush.msra.mxu1 %v336_v6  ;;  %717 = vst.msk [vmem:[%s1027_s10] sm:$0xff] %vm345_vm0, %v709_v22  ;;  %v712_v32 = vadd.f32 %v869_v8, %v700_v20  ;;  %v714_v33 = vadd.f32 %v869_v8, %v702_v30 }
  0x17   : > { %849 = vmatpush.msra.mxu2 %v336_v6  ;;  %850 = vmatpush.msra.mxu3 %v336_v6  ;;  %721 = vst.msk [vmem:[%s1027_s10 + $0x20] sm:$0xff] %vm345_vm0, %v713_v24  ;;  %v716_v34 = vadd.f32 %v869_v8, %v704_v31 }
  0x18   : > { %383 = vmatpush.msra.mxu0 %v335_v7  ;;  %851 = vmatpush.msra.mxu1 %v335_v7  ;;  %723 = vst.msk [vmem:[%s1027_s10 + $0x30] sm:$0xff] %vm345_vm0, %v715_v25  ;;  %v871_v25 = vld [vmem:[%s1184_s3] ss:$0 sm:$0xff] }
  0x19   : > { %852 = vmatpush.msra.mxu2 %v335_v7  ;;  %853 = vmatpush.msra.mxu3 %v335_v7  ;;  %718 = vst.msk [vmem:[%s1027_s10 + $0x8] sm:$0xff] %vm345_vm0, %v710_v29 }
  0x1a   : > { %384 = vmatpush.msra.mxu0 %v334_v21  ;;  %854 = vmatpush.msra.mxu1 %v334_v21  ;;  %720 = vst.msk [vmem:[%s1027_s10 + $0x18] sm:$0xff] %vm345_vm0, %v712_v32 }
  0x1b   : > { %855 = vmatpush.msra.mxu2 %v334_v21  ;;  %856 = vmatpush.msra.mxu3 %v334_v21  ;;  %722 = vst.msk [vmem:[%s1027_s10 + $0x28] sm:$0xff] %vm345_vm0, %v714_v33 }
  0x1c   : > { %385 = vmatpush.msra.mxu0 %v333_v28  ;;  %857 = vmatpush.msra.mxu1 %v333_v28  ;;  %724 = vst.msk [vmem:[%s1027_s10 + $0x38] sm:$0xff] %vm345_vm0, %v716_v34 }
  0x1d   : > { %858 = vmatpush.msra.mxu2 %v333_v28  ;;  %859 = vmatpush.msra.mxu3 %v333_v28 }
  0x1e   : > { %826 = vmatmul.msk.f32.vlgmr.msra.gmra.mxu0 %vm345_vm0, %v325_v9  ;;  %828 = vmatmul.msk.f32.vlgmr.msra.gmra.mxu1 %vm345_vm0, %v327_v10 }
  0x1f   : > { %830 = vmatmul.msk.f32.vlgmr.msra.gmra.mxu2 %vm345_vm0, %v329_v11  ;;  %832 = vmatmul.msk.f32.vlgmr.msra.gmra.mxu3 %vm345_vm0, %v331_v15 }
  0x26   : > { %827 = vmatmul.msk.f32.gmra.mxu0 %vm345_vm0, %v326_v16  ;;  %829 = vmatmul.msk.f32.gmra.mxu1 %vm345_vm0, %v328_v17 }
  0x27   : > { %831 = vmatmul.msk.f32.gmra.mxu2 %vm345_vm0, %v330_v26  ;;  %833 = vmatmul.msk.f32.gmra.mxu3 %vm345_vm0, %v332_v27 }
  0x9b   : > { %v387_v36 = vpop.f32.mrf.mxu0  ;;  %v393_v37 = vpop.f32.mrf.mxu1 }
  0x9c   : > { %v388_v38 = vadd.f32 %v870_v35, %v387_v36  ;;  %v394_v39 = vadd.f32 %v870_v35, %v393_v37 }
  0x9e   : > { %v419_v40 = vmul.f32 %v388_v38, %v388_v38  ;;  %v421_v41 = vmul.f32 %v394_v39, %v394_v39  ;;  %v413_v18 = vmul.f32 0.5, %v394_v39  ;;  %v411_v26 = vmul.f32 0.5, %v388_v38 }
  0xa0   : > { %v427_v42 = vmul.f32 %v419_v40, %v388_v38  ;;  %v429_v43 = vmul.f32 %v421_v41, %v394_v39 }
  0xa2   : > { %v435_v44 = vmul.f32 0.044715, %v427_v42  ;;  %v437_v45 = vmul.f32 0.044715, %v429_v43  ;;  %v399_v46 = vpop.f32.mrf.mxu2  ;;  %v405_v47 = vpop.f32.mrf.mxu3 }
  0xa3   : > { %v1064_v48 = vadd.f32 %v870_v35, %v399_v46  ;;  %v1066_v49 = vadd.f32 %v870_v35, %v405_v47  ;;  %v390_v50 = vpop.f32.mrf.mxu0  ;;  %v396_v51 = vpop.f32.mrf.mxu1 }
  0xa4   : > { %v1068_v52 = vadd.f32 %v870_v35, %v390_v50  ;;  %v1070_v53 = vadd.f32 %v870_v35, %v396_v51  ;;  %v445_v54 = vadd.f32 %v437_v45, %v394_v39  ;;  %v443_v55 = vadd.f32 %v435_v44, %v388_v38 }
  0xa5   : > { %v423_v56 = vmul.f32 %v1064_v48, %v1064_v48  ;;  %v425_v57 = vmul.f32 %v1066_v49, %v1066_v49  ;;  %v415_v43 = vmul.f32 0.5, %v1064_v48 }
  0xa6   : > { %v420_v58 = vmul.f32 %v1068_v52, %v1068_v52  ;;  %v422_v59 = vmul.f32 %v1070_v53, %v1070_v53  ;;  %v453_v60 = vmul.f32 0.7978846, %v445_v54  ;;  %v451_v61 = vmul.f32 0.7978846, %v443_v55 }
  0xa7   : > { %v431_v62 = vmul.f32 %v423_v56, %v1064_v48  ;;  %v433_v63 = vmul.f32 %v425_v57, %v1066_v49  ;;  %v414_v46 = vmul.f32 0.5, %v1070_v53  ;;  %v412_v54 = vmul.f32 0.5, %v1068_v52 }
  0xa8   : > { %v428_v0 = vmul.f32 %v420_v58, %v1068_v52  ;;  %v430_v1 = vmul.f32 %v422_v59, %v1070_v53  ;;  %873 = vtanh.f32 %v453_v60 }
  0xa9   : > { %v439_v2 = vmul.f32 0.044715, %v431_v62  ;;  %v441_v3 = vmul.f32 0.044715, %v433_v63  ;;  %875 = vtanh.f32 %v451_v61  ;;  %v417_v62 = vmul.f32 0.5, %v1066_v49 }
  0xaa   : > { %v436_v4 = vmul.f32 0.044715, %v428_v0  ;;  %v438_v5 = vmul.f32 0.044715, %v430_v1  ;;  %v402_v6 = vpop.f32.mrf.mxu2  ;;  %v408_v7 = vpop.f32.mrf.mxu3 }
  0xab   : > { %v1084_v8 = vadd.f32 %v870_v35, %v402_v6  ;;  %v1086_v9 = vadd.f32 %v870_v35, %v408_v7  ;;  %v447_v10 = vadd.f32 %v439_v2, %v1064_v48  ;;  %v449_v11 = vadd.f32 %v441_v3, %v1066_v49 }
  0xac   : > { %v444_v12 = vadd.f32 %v436_v4, %v1068_v52  ;;  %v446_v13 = vadd.f32 %v438_v5, %v1070_v53 }
  0xad   : > { %v424_v14 = vmul.f32 %v1084_v8, %v1084_v8  ;;  %v426_v15 = vmul.f32 %v1086_v9, %v1086_v9  ;;  %v455_v16 = vmul.f32 0.7978846, %v447_v10  ;;  %v457_v28 = vmul.f32 0.7978846, %v449_v11 }
  0xae   : > { %v874_v17 = vpop.eup %873  ;;  %v454_v19 = vmul.f32 0.7978846, %v446_v13  ;;  %v452_v20 = vmul.f32 0.7978846, %v444_v12  ;;  %v416_v1 = vmul.f32 0.5, %v1084_v8  ;;  %v418_v4 = vmul.f32 0.5, %v1086_v9 }
  0xaf   : > { %v876_v21 = vpop.eup %875  ;;  %v432_v22 = vmul.f32 %v424_v14, %v1084_v8  ;;  %v434_v23 = vmul.f32 %v426_v15, %v1086_v9  ;;  %v469_v24 = vadd.f32 1.0, %v874_v17  ;;  %877 = vtanh.f32 %v455_v16 }
  0xb0   : > { %v467_v27 = vadd.f32 1.0, %v876_v21  ;;  %879 = vtanh.f32 %v454_v19 }
  0xb1   : > { %v440_v29 = vmul.f32 0.044715, %v432_v22  ;;  %v442_v30 = vmul.f32 0.044715, %v434_v23  ;;  %v477_v31 = vmul.f32 %v469_v24, %v413_v18  ;;  %881 = vtanh.f32 %v452_v20 }
  0xb2   : > { %v475_v32 = vmul.f32 %v467_v27, %v411_v26  ;;  %883 = vtanh.f32 %v457_v28 }
  0xb3   : > { %v448_v33 = vadd.f32 %v440_v29, %v1084_v8  ;;  %v450_v34 = vadd.f32 %v442_v30, %v1086_v9  ;;  %v489_v35 = vmul.f32 %v871_v25, %v477_v31  ;;  %v872_v8 = vld [vmem:[#allocation2] ss:$0 sm:$0xff] }
  0xb4   : > { %v487_v36 = vmul.f32 %v871_v25, %v475_v32 }
  0xb5   : > { %v878_v37 = vpop.eup %877  ;;  %v502_v39 = vsel %vm495_vm1, %v489_v35, 0.0  ;;  %v456_v38 = vmul.f32 0.7978846, %v448_v33  ;;  %v458_v40 = vmul.f32 0.7978846, %v450_v34 }
  0xb6   : > { %v880_v41 = vpop.eup %879  ;;  %503 = vadd.xlane.f32.xlu1 %v502_v39  ;;  %v496_v42 = vsel %vm495_vm1, %v487_v36, 0.0  ;;  %v471_v44 = vadd.f32 1.0, %v878_v37 }
  0xb7   : > { %v882_v45 = vpop.eup %881  ;;  %497 = vadd.xlane.f32.xlu0 %v496_v42  ;;  %v470_v47 = vadd.f32 1.0, %v880_v41  ;;  %885 = vtanh.f32 %v456_v38 }
  0xb8   : > { %v884_v50 = vpop.eup %883  ;;  %v479_v51 = vmul.f32 %v471_v44, %v415_v43  ;;  %v468_v55 = vadd.f32 1.0, %v882_v45  ;;  %887 = vtanh.f32 %v458_v40 }
  0xb9   : > { %v478_v56 = vmul.f32 %v470_v47, %v414_v46  ;;  %v473_v59 = vadd.f32 1.0, %v884_v50 }
  0xba   : > { %v491_v57 = vmul.f32 %v871_v25, %v479_v51  ;;  %v476_v58 = vmul.f32 %v468_v55, %v412_v54 }
  0xbb   : > { %v490_v60 = vmul.f32 %v871_v25, %v478_v56  ;;  %v481_v3 = vmul.f32 %v473_v59, %v417_v62 }
  0xbc   : > { %v508_v48 = vsel %vm495_vm1, %v491_v57, 0.0  ;;  %v488_v61 = vmul.f32 %v871_v25, %v476_v58 }
  0xbd   : > { %v886_v63 = vpop.eup %885  ;;  %509 = vadd.xlane.f32.xlu2 %v508_v48  ;;  %v505_v53 = vsel %vm495_vm1, %v490_v60, 0.0  ;;  %v493_v49 = vmul.f32 %v871_v25, %v481_v3 }
  0xbe   : > { %v888_v0 = vpop.eup %887  ;;  %506 = vadd.xlane.f32.xlu1 %v505_v53  ;;  %v499_v52 = vsel %vm495_vm1, %v488_v61, 0.0  ;;  %v472_v2 = vadd.f32 1.0, %v886_v63 }
  0xbf   : > { %500 = vadd.xlane.f32.xlu0 %v499_v52  ;;  %v474_v5 = vadd.f32 1.0, %v888_v0  ;;  %v514_v14 = vsel %vm495_vm1, %v493_v49, 0.0 }
  0xc0   : > { %v480_v6 = vmul.f32 %v472_v2, %v416_v1 }
  0xc1   : > { %v482_v7 = vmul.f32 %v474_v5, %v418_v4 }
  0xc2   : > { %v492_v10 = vmul.f32 %v871_v25, %v480_v6 }
  0xc3   : > { %v494_v11 = vmul.f32 %v871_v25, %v482_v7 }
  0xc4   : > { %v511_v12 = vsel %vm495_vm1, %v492_v10, 0.0 }
  0xc5   : > { %512 = vadd.xlane.f32.xlu2 %v511_v12  ;;  %v517_v13 = vsel %vm495_vm1, %v494_v11, 0.0 }
  0xc6   : > { %518 = vadd.xlane.f32.xlu1 %v517_v13 }
  0xc7   : > { %515 = vadd.xlane.f32.xlu0 %v514_v14 }
 0x129   : > { %v504_v15 = vpop.xlane.xlu1 %503 }
 0x12a   : > { %v526_v16 = vadd.f32 %v872_v8, %v504_v15  ;;  %v498_v17 = vpop.xlane.xlu0 %497 }
 0x12b   : > { %v524_v9 = vadd.f32 %v872_v8, %v498_v17 }
 0x12c   : > { %v534_v18 = vsub.f32 0.0, %v526_v16 }
 0x12d   : > { %v532_v19 = vsub.f32 0.0, %v524_v9 }
 0x12e   : > { %v544_v20 = vmul.f32 1.442695, %v534_v18 }
 0x12f   : > { %v540_v21 = vmul.f32 1.442695, %v532_v19 }
 0x130   : > { %889 = vpow2.f32 %v544_v20  ;;  %v510_v22 = vpop.xlane.xlu2 %509 }
 0x131   : > { %891 = vpow2.f32 %v540_v21  ;;  %v528_v23 = vadd.f32 %v872_v8, %v510_v22  ;;  %v507_v24 = vpop.xlane.xlu1 %506 }
 0x132   : > { %v527_v25 = vadd.f32 %v872_v8, %v507_v24  ;;  %v501_v26 = vpop.xlane.xlu0 %500 }
 0x133   : > { %v536_v27 = vsub.f32 0.0, %v528_v23  ;;  %v525_v28 = vadd.f32 %v872_v8, %v501_v26 }
 0x134   : > { %v535_v29 = vsub.f32 0.0, %v527_v25 }
 0x135   : > { %v548_v30 = vmul.f32 1.442695, %v536_v27  ;;  %v533_v31 = vsub.f32 0.0, %v525_v28 }
 0x136   : > { %v890_v32 = vpop.eup %889  ;;  %v546_v33 = vmul.f32 1.442695, %v535_v29 }
 0x137   : > { %v892_v34 = vpop.eup %891  ;;  %v558_v35 = vadd.f32 1.0, %v890_v32  ;;  %893 = vpow2.f32 %v548_v30  ;;  %v542_v36 = vmul.f32 1.442695, %v533_v31 }
 0x138   : > { %v556_v37 = vadd.f32 1.0, %v892_v34  ;;  %895 = vpow2.f32 %v546_v33  ;;  %v513_v39 = vpop.xlane.xlu2 %512 }
 0x139   : > { %897 = vrcp.f32 %v558_v35  ;;  %v519_v38 = vpop.xlane.xlu1 %518  ;;  %v529_v40 = vadd.f32 %v872_v8, %v513_v39  ;;  %vm599_vm3 = vweird.f32 %v558_v35  ;;  %v603_v48 = vand.u32 2147483647, %v558_v35 }
 0x13a   : > { %899 = vrcp.f32 %v556_v37  ;;  %v516_v41 = vpop.xlane.xlu0 %515  ;;  %v531_v44 = vadd.f32 %v872_v8, %v519_v38  ;;  %v605_v62 = vand.u32 2147483648, %v558_v35  ;;  %v573_v53 = vand.u32 2147483647, %v556_v37 }
 0x13b   : > { %901 = vpow2.f32 %v542_v36  ;;  %v537_v43 = vsub.f32 0.0, %v529_v40  ;;  %v530_v47 = vadd.f32 %v872_v8, %v516_v41  ;;  %v575_v0 = vand.u32 2147483648, %v556_v37 }
 0x13c   : > { %v539_v59 = vsub.f32 0.0, %v531_v44  ;;  %vm569_vm5 = vweird.f32 %v556_v37  ;;  %vm604_vm7 = vcmp.eq.f32.partialorder %v603_v48, 8.507059e+37  ;;  %v606_v7 = vor.u32 1.1754944e-38, %v605_v62 }
 0x13d   : > { %v894_v42 = vpop.eup %893  ;;  %v550_v56 = vmul.f32 1.442695, %v537_v43  ;;  %v538_v61 = vsub.f32 0.0, %v530_v47  ;;  %vm574_vm9 = vcmp.eq.f32.partialorder %v573_v53, 8.507059e+37  ;;  %v576_v13 = vor.u32 1.1754944e-38, %v575_v0 }
 0x13e   : > { %v896_v45 = vpop.eup %895  ;;  %v1117_v46 = vadd.f32 1.0, %v894_v42  ;;  %v554_v3 = vmul.f32 1.442695, %v539_v59 }
 0x13f   : > { %v898_v50 = vpop.eup %897  ;;  %v1119_v51 = vadd.f32 1.0, %v896_v45  ;;  %v552_v6 = vmul.f32 1.442695, %v538_v61 }
 0x140   : > { %v900_v54 = vpop.eup %899  ;;  %v595_v55 = vmul.f32 %v898_v50, %v558_v35  ;;  %903 = vrcp.f32 %v1117_v46  ;;  %vm600_vm4 = vweird.f32 %v898_v50  ;;  %v633_v14 = vand.u32 2147483647, %v1117_v46 }
 0x141   : > { %v902_v57 = vpop.eup %901  ;;  %v565_v58 = vmul.f32 %v900_v54, %v556_v37  ;;  %905 = vrcp.f32 %v1119_v51  ;;  %vm570_vm6 = vweird.f32 %v900_v54  ;;  %vm601_vm8 = vmor %vm599_vm3, %vm600_vm4  ;;  %v635_v19 = vand.u32 2147483648, %v1117_v46 }
 0x142   : > { %v596_v60 = vsub.f32 1.0, %v595_v55  ;;  %v1123_v1 = vadd.f32 1.0, %v902_v57  ;;  %907 = vpow2.f32 %v550_v56  ;;  %vm571_vm10 = vmor %vm569_vm5, %vm570_vm6  ;;  %v618_v20 = vand.u32 2147483647, %v1119_v51 }
 0x143   : > { %v566_v63 = vsub.f32 1.0, %v565_v58  ;;  %vm629_vm12 = vweird.f32 %v1117_v46  ;;  %vm614_vm13 = vweird.f32 %v1119_v51  ;;  %v620_v25 = vand.u32 2147483648, %v1119_v51 }
 0x144   : > { %v597_v52 = vmul.f32 %v898_v50, %v596_v60  ;;  %909 = vrcp.f32 %v1123_v1  ;;  %vm634_vm0 = vcmp.eq.f32.partialorder %v633_v14, 8.507059e+37  ;;  %v636_v30 = vor.u32 1.1754944e-38, %v635_v19 }
 0x145   : > { %v567_v2 = vmul.f32 %v900_v54, %v566_v63  ;;  %911 = vpow2.f32 %v554_v3  ;;  %vm1150_vm1 = vcmp.eq.f32.partialorder %v618_v20, 8.507059e+37  ;;  %v621_v39 = vor.u32 1.1754944e-38, %v620_v25 }
 0x146   : > { %v904_v4 = vpop.eup %903  ;;  %v598_v5 = vadd.f32 %v898_v50, %v597_v52  ;;  %913 = vpow2.f32 %v552_v6  ;;  %v588_v38 = vand.u32 2147483647, %v1123_v1  ;;  %v590_v40 = vand.u32 2147483648, %v1123_v1 }
 0x147   : > { %v568_v10 = vadd.f32 %v900_v54, %v567_v2  ;;  %v625_v49 = vmul.f32 %v904_v4, %v1117_v46  ;;  %v906_v11 = vpop.eup %905  ;;  %vm630_vm11 = vweird.f32 %v904_v4  ;;  %vm584_vm5 = vweird.f32 %v1123_v1 }
 0x148   : > { %v602_v12 = vsel %vm601_vm8, %v898_v50, %v598_v5  ;;  %v610_v17 = vmul.f32 %v906_v11, %v1119_v51  ;;  %v908_v9 = vpop.eup %907  ;;  %vm615_vm14 = vweird.f32 %v906_v11  ;;  %vm631_vm15 = vmor %vm629_vm12, %vm630_vm11  ;;  %v591_v47 = vor.u32 1.1754944e-38, %v590_v40 }
 0x149   : > { %v607_v8 = vsel %vm604_vm7, %v606_v7, %v602_v12  ;;  %v572_v15 = vsel %vm571_vm10, %v900_v54, %v568_v10  ;;  %v626_v16 = vsub.f32 1.0, %v625_v49  ;;  %v1144_v23 = vadd.f32 1.0, %v908_v9  ;;  %vm616_vm3 = vmor %vm614_vm13, %vm615_vm14 }
 0x14a   : > { %687 = vst.msk [vmem:[%s1130_s21 + $0x10] sm:$0xff] %vm684_vm2, %v607_v8  ;;  %v577_v18 = vsel %vm574_vm9, %v576_v13, %v572_v15  ;;  %v611_v22 = vsub.f32 1.0, %v610_v17  ;;  %v910_v24 = vpop.eup %909  ;;  %vm589_vm7 = vcmp.eq.f32.partialorder %v588_v38, 8.507059e+37 }
 0x14b   : > { %685 = vst.msk [vmem:[%s1130_s21] sm:$0xff] %vm684_vm2, %v577_v18  ;;  %v627_v21 = vmul.f32 %v904_v4, %v626_v16  ;;  %v580_v28 = vmul.f32 %v910_v24, %v1123_v1  ;;  %v912_v29 = vpop.eup %911  ;;  %915 = vrcp.f32 %v1144_v23  ;;  %vm585_vm4 = vweird.f32 %v910_v24 }
 0x14c   : > { %v612_v27 = vmul.f32 %v906_v11, %v611_v22  ;;  %v563_v35 = vadd.f32 1.0, %v912_v29  ;;  %v914_v36 = vpop.eup %913  ;;  %vm586_vm6 = vmor %vm584_vm5, %vm585_vm4  ;;  %v650_v57 = vand.u32 2147483648, %v1144_v23  ;;  %v648_v60 = vand.u32 2147483647, %v1144_v23 }
 0x14d   : > { %v628_v26 = vadd.f32 %v904_v4, %v627_v21  ;;  %v581_v34 = vsub.f32 1.0, %v580_v28  ;;  %v562_v44 = vadd.f32 1.0, %v914_v36  ;;  %vm644_vm9 = vweird.f32 %v1144_v23 }
 0x14e   : > { %v613_v33 = vadd.f32 %v906_v11, %v612_v27  ;;  %917 = vrcp.f32 %v563_v35  ;;  %v680_v63 = vand.u32 2147483648, %v563_v35  ;;  %v651_v0 = vor.u32 1.1754944e-38, %v650_v57 }
 0x14f   : > { %v632_v32 = vsel %vm631_vm15, %v904_v4, %v628_v26  ;;  %v582_v42 = vmul.f32 %v910_v24, %v581_v34  ;;  %919 = vrcp.f32 %v562_v44  ;;  %v678_v1 = vand.u32 2147483647, %v563_v35 }
 0x150   : > { %v637_v37 = vsel %vm634_vm0, %v636_v30, %v632_v32  ;;  %v617_v41 = vsel %vm616_vm3, %v906_v11, %v613_v33  ;;  %vm649_vm12 = vcmp.eq.f32.partialorder %v648_v60, 8.507059e+37  ;;  %vm674_vm13 = vweird.f32 %v563_v35 }
 0x151   : > { %689 = vst.msk [vmem:[%s1130_s21 + $0x20] sm:$0xff] %vm684_vm2, %v637_v37  ;;  %v622_v43 = vsel %vm1150_vm1, %v621_v39, %v617_v41  ;;  %v583_v45 = vadd.f32 %v910_v24, %v582_v42  ;;  %v916_v46 = vpop.eup %915  ;;  %v665_v6 = vand.u32 2147483648, %v562_v44  ;;  %v681_v7 = vor.u32 1.1754944e-38, %v680_v63 }
 0x152   : > { %688 = vst.msk [vmem:[%s1130_s21 + $0x18] sm:$0xff] %vm684_vm2, %v622_v43  ;;  %v640_v51 = vmul.f32 %v916_v46, %v1144_v23  ;;  %vm645_vm8 = vweird.f32 %v916_v46  ;;  %v663_v49 = vand.u32 2147483647, %v562_v44  ;;  %vm679_vm0 = vcmp.eq.f32.partialorder %v678_v1, 8.507059e+37 }
 0x153   : > { %v587_v50 = vsel %vm586_vm6, %v910_v24, %v583_v45  ;;  %vm646_vm10 = vmor %vm644_vm9, %vm645_vm8  ;;  %vm659_vm1 = vweird.f32 %v562_v44  ;;  %v666_v14 = vor.u32 1.1754944e-38, %v665_v6 }
 0x154   : > { %v592_v54 = vsel %vm589_vm7, %v591_v47, %v587_v50  ;;  %v918_v55 = vpop.eup %917  ;;  %v641_v56 = vsub.f32 1.0, %v640_v51  ;;  %vm664_vm4 = vcmp.eq.f32.partialorder %v663_v49, 8.507059e+37 }
 0x155   : > { %686 = vst.msk [vmem:[%s1130_s21 + $0x8] sm:$0xff] %vm684_vm2, %v592_v54  ;;  %v670_v58 = vmul.f32 %v918_v55, %v563_v35  ;;  %v920_v48 = vpop.eup %919  ;;  %vm675_vm11 = vweird.f32 %v918_v55 }
 0x156   : > { %v642_v59 = vmul.f32 %v916_v46, %v641_v56  ;;  %v655_v53 = vmul.f32 %v920_v48, %v562_v44  ;;  %vm676_vm14 = vmor %vm674_vm13, %vm675_vm11  ;;  %vm660_vm15 = vweird.f32 %v920_v48 }
 0x157   : > { %v671_v61 = vsub.f32 1.0, %v670_v58  ;;  %vm661_vm3 = vmor %vm659_vm1, %vm660_vm15 }
 0x158   : > { %v643_v62 = vadd.f32 %v916_v46, %v642_v59  ;;  %v656_v3 = vsub.f32 1.0, %v655_v53 }
 0x159   : > { %v672_v52 = vmul.f32 %v918_v55, %v671_v61 }
 0x15a   : > { %v647_v2 = vsel %vm646_vm10, %v916_v46, %v643_v62  ;;  %v657_v10 = vmul.f32 %v920_v48, %v656_v3 }
 0x15b   : > { %v652_v4 = vsel %vm649_vm12, %v651_v0, %v647_v2  ;;  %v673_v5 = vadd.f32 %v918_v55, %v672_v52 }
 0x15c   : > { %690 = vst.msk [vmem:[%s1130_s21 + $0x28] sm:$0xff] %vm684_vm2, %v652_v4  ;;  %v658_v13 = vadd.f32 %v920_v48, %v657_v10 }
 0x15d   : > { %v677_v11 = vsel %vm676_vm14, %v918_v55, %v673_v5 }
 0x15e   : > { %v682_v12 = vsel %vm679_vm0, %v681_v7, %v677_v11  ;;  %v662_v8 = vsel %vm661_vm3, %v920_v48, %v658_v13 }
 0x15f   : > { %692 = vst.msk [vmem:[%s1130_s21 + $0x38] sm:$0xff] %vm684_vm2, %v682_v12  ;;  %v667_v15 = vsel %vm664_vm4, %v666_v14, %v662_v8 }
 0x160   : > { %691 = vst.msk [vmem:[%s1130_s21 + $0x30] sm:$0xff] %vm684_vm2, %v667_v15 }
 0x161 PF: > { %s21_s29 = sadd.s32 1, %s927_s29  }
 0x162   : > { %p18_p4 = scmp.ge.s32.totalorder %s21_s29, 4  }
 0x164   :  { %20 = sbr.rel (!%p18_p4) target bundleno = 3 (0x3), region = 90 }

</bundles_post_ra>
